<compile_context>
chip_gen: v7x
topology: tpu7x:2x2x1
jax: 0.10.0
libtpu: 0.0.40
codegen_flags: <defaults>
</compile_context>

<pallas_src>
import functools

import jax
import jax.numpy as jnp
from jax.experimental import pallas as pl
from jax.experimental.pallas import tpu as pltpu


# ---------------------------------------------------------------------------
# Kernel
# ---------------------------------------------------------------------------
def _dropout_kernel(seed_ref, x_ref, o_ref, *, threshold, scale):
    """Elementwise dropout on one [tm, d] tile.

    keep-mask = lowbias32(row*C1 + col*C2 + seed*C3) >= threshold, with
    threshold = round(p * 2^32)  =>  P(keep) = 1 - p.  The mask depends only on
    the *global* element position and the seed, never on the tile size, so
    results are reproducible across tilings / chip generations.
    """
    tm, d = x_ref.shape
    row0 = pl.program_id(0) * tm                                   # int32 scalar
    rows = jax.lax.broadcasted_iota(jnp.int32, (tm, d), 0) + row0
    cols = jax.lax.broadcasted_iota(jnp.int32, (tm, d), 1)

    seed_u = seed_ref[0].astype(jnp.uint32)                        # non-negative
    key = (rows.astype(jnp.uint32) * jnp.uint32(0x9E3779B1)
           + cols.astype(jnp.uint32) * jnp.uint32(0x85EBCA77)
           + seed_u * jnp.uint32(0xC2B2AE3D))
    # lowbias32 finalizer (good 32-bit avalanche, pure VPU integer ops).
    key ^= key >> 16
    key *= jnp.uint32(0x7FEB352D)
    key ^= key >> 15
    key *= jnp.uint32(0x846CA68B)
    key ^= key >> 16

    keep = key >= jnp.uint32(threshold)                            # P = 1 - p

    x = x_ref[...]                                                 # native dtype
    scale_c = jnp.asarray(scale, dtype=x.dtype)                    # bf16 stays bf16
    o_ref[...] = jnp.where(keep, x * scale_c, jnp.asarray(0, dtype=x.dtype))


# ---------------------------------------------------------------------------
# Wrappers
# ---------------------------------------------------------------------------
def _pick_tile_rows(n, d, itemsize, target_bytes):
    """Largest row tile (multiple of 8) keeping one block around target_bytes."""
    row_bytes = max(1, d * itemsize)
    tm = max(8, (target_bytes // row_bytes) // 8 * 8)
    n_pad8 = ((n + 7) // 8) * 8
    return int(min(tm, max(8, n_pad8)))


def pallas_dropout_2d(x2d, p, seed, training=True, *,
                      target_block_bytes=2 * 1024 * 1024, donate=False):
    """Dropout over a 2-D array with a single Pallas pass (HBM-bandwidth bound)."""
    if (not training) or p <= 0.0:
        return x2d
    if p >= 1.0:
        return jnp.zeros_like(x2d)

    n, d = x2d.shape
    tm = _pick_tile_rows(n, d, x2d.dtype.itemsize, target_block_bytes)
    grid = (pl.cdiv(n, tm),)                 # partial last block handled by Pallas

    threshold = int(round(float(p) * (1 << 32)))
    threshold = max(1, min(threshold, (1 << 32) - 1))
    scale = 1.0 / (1.0 - float(p))

    kernel = functools.partial(_dropout_kernel, threshold=threshold, scale=scale)
    seed_arr = jnp.bitwise_and(jnp.asarray(seed, jnp.int32),
                               jnp.int32(0x7FFFFFFF)).reshape(1)

    call_kwargs = {}
    if donate:
        # dropout is naturally in-place; alias x (input 1, after the seed) to out 0
        call_kwargs["input_output_aliases"] = {1: 0}

    return pl.pallas_call(
        kernel,
        out_shape=jax.ShapeDtypeStruct((n, d), x2d.dtype),
        grid_spec=pltpu.PrefetchScalarGridSpec(
            num_scalar_prefetch=1,
            grid=grid,
            in_specs=[pl.BlockSpec((tm, d), lambda i, s_ref: (i, 0))],
            out_specs=pl.BlockSpec((tm, d), lambda i, s_ref: (i, 0)),
        ),
        compiler_params=pltpu.CompilerParams(
            dimension_semantics=("parallel",)),   # rows independent; shards on v7x
        **call_kwargs,
    )(seed_arr, x2d)


def pallas_dropout_flat(values, p, seed, training=True):
    """Dropout over a 1-D vector, laid out lane/sublane-dense as [rows, 128]."""
    if (not training) or p <= 0.0:
        return values
    if p >= 1.0:
        return jnp.zeros_like(values)
    nnz = values.shape[0]
    lane = 128
    tile = 8 * lane                                    # 1024: full (8,128) vreg tiles
    n_pad = ((nnz + tile - 1) // tile) * tile
    v = values if n_pad == nnz else jnp.pad(values, (0, n_pad - nnz))
    out = pallas_dropout_2d(v.reshape(n_pad // lane, lane), p, seed, training)
    return out.reshape(n_pad)[:nnz]


class MixedDropoutPallas:
    """JAX/Pallas equivalent of MixedDropout (dense nn.Dropout + SparseDropout)."""

    def __init__(self, p):
        self.p = float(p)
        self.training = True

    def __call__(self, inp, seed=0):
        # Sparse COO tensors are represented as (indices, values, shape).
        if isinstance(inp, tuple) and len(inp) == 3:
            indices, values, shape = inp
            # TODO(synk): torch .coalesce() (dedup of repeated indices) has no
            # clean Pallas equivalent; inputs are assumed already coalesced.
            dropped = pallas_dropout_flat(values, self.p, seed, self.training)
            return (indices, dropped, shape)
        # Dense path: flatten trailing dims to 2-D, run kernel, restore shape.
        x = inp
        if x.ndim == 1:
            return pallas_dropout_flat(x, self.p, seed, self.training)
        orig_shape = x.shape
        x2d = x.reshape(orig_shape[0], -1)
        out = pallas_dropout_2d(x2d, self.p, seed, self.training)
        return out.reshape(orig_shape)


# ---------------------------------------------------------------------------
# Self-test
# ---------------------------------------------------------------------------
if __name__ == "__main__":
    key = jax.random.PRNGKey(0)
    k_dense, k_vals = jax.random.split(key)

    p = 0.5
    layer = MixedDropoutPallas(p)

    # --- dense input: [N, F] node features ---
    x_dense = jax.random.normal(k_dense, (16, 128), dtype=jnp.float32)
    y_dense = jax.block_until_ready(layer(x_dense, seed=42))
    assert y_dense.shape == x_dense.shape
    nz = y_dense != 0.0
    # survivors are exactly x / (1 - p); dropped are exactly 0
    assert jnp.allclose(jnp.where(nz, y_dense, 0.0),
                        jnp.where(nz, x_dense / (1.0 - p), 0.0), atol=1e-5)
    frac_kept = float(jnp.mean(nz.astype(jnp.float32)))
    assert 0.3 < frac_kept < 0.7, f"unexpected keep fraction {frac_kept}"

    # --- sparse input: COO (indices, values, shape) ---
    nnz = 64
    idx = jnp.stack([jnp.arange(nnz, dtype=jnp.int32) % 16,
                     jnp.arange(nnz, dtype=jnp.int32) % 128])
    vals = jax.random.normal(k_vals, (nnz,), dtype=jnp.float32)
    sp_idx, sp_vals, sp_shape = layer((idx, vals, (16, 128)), seed=7)
    jax.block_until_ready(sp_vals)
    assert sp_vals.shape == vals.shape and sp_idx.shape == idx.shape
    nzv = sp_vals != 0.0
    assert jnp.allclose(jnp.where(nzv, sp_vals, 0.0),
                        jnp.where(nzv, vals / (1.0 - p), 0.0), atol=1e-5)

    # --- eval mode is identity ---
    layer.training = False
    y_eval = jax.block_until_ready(layer(x_dense))
    assert jnp.array_equal(y_eval, x_dense)

    print("KERNEL_OK")
</pallas_src>

<mosaic_0001>
module attributes {stable_mosaic.version = 11 : i64} {
  func.func @_dropout_kernel(%arg0: i32, %arg1: memref<1xi32, #tpu.memory_space<smem>>, %arg2: memref<16x128xf32, #tpu.memory_space<vmem>>, %arg3: memref<16x128xf32, #tpu.memory_space<vmem>>) attributes {dimension_semantics = [#tpu.dimension_semantics<parallel>], iteration_bounds = array<i64: 1>, scalar_prefetch = 1 : i64, scratch_operands = 0 : i64, tpu.core_type = #tpu.core_type<tc>, window_params = [{transform_indices = @transform_0, window_bounds = array<i64: 16, 128>}, {transform_indices = @transform_1, window_bounds = array<i64: 16, 128>}]} {
    %c16_i32 = arith.constant 16 : i32
    %0 = arith.muli %arg0, %c16_i32 : i32
    %1 = tpu.iota {dimensions = array<i32: 0>} : vector<16x128xi32>
    %2 = vector.broadcast %0 : i32 to vector<16x128xi32>
    %3 = arith.addi %1, %2 : vector<16x128xi32>
    %4 = tpu.iota {dimensions = array<i32: 1>} : vector<16x128xi32>
    %c0 = arith.constant 0 : index
    %5 = memref.load %arg1[%c0] : memref<1xi32, #tpu.memory_space<smem>>
    %c-1640531535_i32 = arith.constant -1640531535 : i32
    %6 = vector.broadcast %c-1640531535_i32 : i32 to vector<16x128xi32>
    %7 = arith.muli %3, %6 : vector<16x128xi32>
    %c-2048144777_i32 = arith.constant -2048144777 : i32
    %8 = vector.broadcast %c-2048144777_i32 : i32 to vector<16x128xi32>
    %9 = arith.muli %4, %8 : vector<16x128xi32>
    %10 = arith.addi %7, %9 : vector<16x128xi32>
    %c-1028477379_i32 = arith.constant -1028477379 : i32
    %11 = arith.muli %5, %c-1028477379_i32 : i32
    %12 = vector.broadcast %11 : i32 to vector<16x128xi32>
    %13 = arith.addi %10, %12 : vector<16x128xi32>
    %c16_i32_0 = arith.constant 16 : i32
    %14 = vector.broadcast %c16_i32_0 : i32 to vector<16x128xi32>
    %15 = arith.shrui %13, %14 : vector<16x128xi32>
    %16 = arith.xori %13, %15 : vector<16x128xi32>
    %c2146121005_i32 = arith.constant 2146121005 : i32
    %17 = vector.broadcast %c2146121005_i32 : i32 to vector<16x128xi32>
    %18 = arith.muli %16, %17 : vector<16x128xi32>
    %c15_i32 = arith.constant 15 : i32
    %19 = vector.broadcast %c15_i32 : i32 to vector<16x128xi32>
    %20 = arith.shrui %18, %19 : vector<16x128xi32>
    %21 = arith.xori %18, %20 : vector<16x128xi32>
    %c-2073254261_i32 = arith.constant -2073254261 : i32
    %22 = vector.broadcast %c-2073254261_i32 : i32 to vector<16x128xi32>
    %23 = arith.muli %21, %22 : vector<16x128xi32>
    %c16_i32_1 = arith.constant 16 : i32
    %24 = vector.broadcast %c16_i32_1 : i32 to vector<16x128xi32>
    %25 = arith.shrui %23, %24 : vector<16x128xi32>
    %26 = arith.xori %23, %25 : vector<16x128xi32>
    %c-2147483648_i32 = arith.constant -2147483648 : i32
    %27 = vector.broadcast %c-2147483648_i32 : i32 to vector<16x128xi32>
    %28 = arith.cmpi uge, %26, %27 : vector<16x128xi32>
    %c0_2 = arith.constant 0 : index
    %c0_3 = arith.constant 0 : index
    %29 = vector.load %arg2[%c0_2, %c0_3] : memref<16x128xf32, #tpu.memory_space<vmem>>, vector<16x128xf32>
    %cst = arith.constant 2.000000e+00 : f32
    %30 = vector.broadcast %cst : f32 to vector<16x128xf32>
    %31 = arith.mulf %29, %30 : vector<16x128xf32>
    %cst_4 = arith.constant 0.000000e+00 : f32
    %32 = vector.broadcast %cst_4 : f32 to vector<16x128xf32>
    %33 = arith.select %28, %31, %32 : vector<16x128xi1>, vector<16x128xf32>
    %c0_5 = arith.constant 0 : index
    %c0_6 = arith.constant 0 : index
    %34 = vector.load %arg3[%c0_5, %c0_6] : memref<16x128xf32, #tpu.memory_space<vmem>>, vector<16x128xf32>
    tpu.vector_store %arg3[%c0_5, %c0_6], %33 {strides = array<i32>} : memref<16x128xf32, #tpu.memory_space<vmem>>, vector<16x128xf32>,
    return
  }
  func.func @transform_0(%arg0: i32, %arg1: memref<1xi32, #tpu.memory_space<smem>>) -> (i32, i32) {
    %c0_i32 = arith.constant 0 : i32
    %c0_i32_0 = arith.constant 0 : i32
    return %arg0, %c0_i32 : i32, i32
  }
  func.func @transform_1(%arg0: i32, %arg1: memref<1xi32, #tpu.memory_space<smem>>) -> (i32, i32) {
    %c0_i32 = arith.constant 0 : i32
    %c0_i32_0 = arith.constant 0 : i32
    return %arg0, %c0_i32 : i32, i32
  }
}

</mosaic_0001>

<bundles_post_ra>
// kernel: tpu_custom_call.1
= control target key start
LH: loop header
LB: loop body
LE: loop exit
PB: predicated region body
PF: predicated region fallthrough
CT: control target
= control target key end

     0   :  { %8 = vsyncpa [#allocation5], 0  ;;  %s191_s0 = inlined_call_operand.<no memory space> [shape: s32[1], index: 0, kind: input, shape index: {}]   ;;  %s192_s1 = inlined_call_operand.hbm [shape: f32[16,128], index: 1, kind: input, shape index: {}]   ;;  %s193_s2 = inlined_call_operand.hbm [shape: f32[16,128], index: 2, kind: output, shape index: {}]  }
   0x1   :  { %9 = vsyncpa [#allocation6], 0  ;;  %s139_s9 = smov [#allocation4]   ;;  %s91_s13 = scalar_lea.hbm %s192_s1, 256 }
   0x2   :  { %s15_s10 = sshll.u32 %s139_s9, 4  ;;  %p92_p0 = scmp.ne.s32.totalorder %s192_s1, %s91_s13  ;;  %s16_s10 = int_to_ptr.vmem [resolvable:$true] %s15_s10 }
   0x3   :  { %p95_p1 = scmp.lt.u32.totalorder %s91_s13, %s192_s1 }
   0x5   :  { %p97_p2 = pnand %p95_p1, %p92_p0 }
   0x7   :  { %100 = shalt.err (!%p97_p2)
}
   0x8   :  { %s101_s18 = scalar_lea.vmem %s16_s10, 256  ;;  %p106_p4 = scmp.lt.s32.totalorder %s16_s10, %s16_s10 }
   0x9   :  { %p102_p3 = scmp.ne.s32.totalorder %s16_s10, %s101_s18  ;;  %p107_p5 = scmp.lt.s32.totalorder %s101_s18, %s101_s18 }
   0xb   :  { %p108_p6 = por %p107_p5, %p106_p4 }
   0xd   :  { %p109_p7 = pnand %p108_p6, %p102_p3 }
   0xf   :  { %112 = shalt.err (!%p109_p7)
}
  0x10   :  { %s140_s19 = smov 128   ;;  %s141_s20 = smov 8  }
  0x11   :  { %21 = dma.hbm_to_vmem [thread:$0]  %s192_s1, 256, %s16_s10, [#allocation5], %s140_s19, %s140_s19, %s141_s20  }
  0x12   :  { %135 = dma.done.wait [#allocation5], 256  }
  0x13   :  { %136 = vsyncadd [#allocation5], 4294967040  ;;  %v26_v0 = vlaneseq  ;;  %s40_s25 = smul.u32 3266489917, %s191_s0  ;;  %v62_v22 = vld [vmem:[#allocation4] sm:$0xff]  ;;  %v63_v26 = vld [vmem:[#allocation4 + $0x8] sm:$0xff] }
  0x14   :  { %v64_v27 = vmul.f32 2.0, %v62_v22  ;;  %v65_v30 = vmul.f32 2.0, %v63_v26  ;;  %s142_s0 = smov [#allocation7]  }
  0x15   :  { %v27_v1 = vshrl.u32 %v26_v0, 7  ;;  %v33_v2 = vand.u32 127, %v26_v0  ;;  %v41_v6 = vstv %s40_s25  ;;  %s75_s1 = sshll.u32 %s142_s0, 4  ;;  %s76_s1 = int_to_ptr.vmem [resolvable:$true] %s75_s1 }
  0x16   :  { %s113_s26 = scalar_lea.vmem %s76_s1, 256  ;;  %p118_p9 = scmp.lt.s32.totalorder %s76_s1, %s76_s1 }
  0x17   :  { %v35_v3 = vmul.u32 2654435761, %v27_v1  ;;  %v37_v4 = vmul.u32 2246822519, %v33_v2  ;;  %v28_v5 = vadd.s32 8, %v27_v1  ;;  %p114_p8 = scmp.ne.s32.totalorder %s76_s1, %s113_s26  ;;  %p119_p10 = scmp.lt.s32.totalorder %s113_s26, %s113_s26 }
  0x19   :  { %v38_v7 = vadd.s32 %v37_v4, %v35_v3  ;;  %v36_v8 = vmul.u32 2654435761, %v28_v5  ;;  %p120_p11 = por %p119_p10, %p118_p9 }
  0x1b   :  { %v42_v9 = vadd.s32 %v41_v6, %v38_v7  ;;  %v39_v10 = vadd.s32 %v37_v4, %v36_v8  ;;  %p121_p12 = pnand %p120_p11, %p114_p8 }
  0x1d   :  { %v44_v11 = vshrl.u32 %v42_v9, 16  ;;  %v43_v12 = vadd.s32 %v41_v6, %v39_v10 }
  0x1f   :  { %v46_v13 = vxor.u32 %v44_v11, %v42_v9  ;;  %v45_v14 = vshrl.u32 %v43_v12, 16 }
  0x21   :  { %v48_v15 = vmul.u32 2146121005, %v46_v13  ;;  %v47_v16 = vxor.u32 %v45_v14, %v43_v12 }
  0x23   :  { %v50_v17 = vshrl.u32 %v48_v15, 15  ;;  %v49_v18 = vmul.u32 2146121005, %v47_v16 }
  0x25   :  { %v52_v19 = vxor.u32 %v50_v17, %v48_v15  ;;  %v51_v20 = vshrl.u32 %v49_v18, 15 }
  0x27   :  { %v54_v21 = vmul.u32 2221713035, %v52_v19  ;;  %v53_v23 = vxor.u32 %v51_v20, %v49_v18 }
  0x29   :  { %v56_v24 = vshrl.u32 %v54_v21, 16  ;;  %v55_v25 = vmul.u32 2221713035, %v53_v23 }
  0x2b   :  { %v58_v28 = vxor.u32 %v56_v24, %v54_v21  ;;  %v57_v29 = vshrl.u32 %v55_v25, 16 }
  0x2d   :  { %vm60_vm0 = vcmp.ge.u32.totalorder %v58_v28, 2147483648  ;;  %v59_v31 = vxor.u32 %v57_v29, %v55_v25 }
  0x2e   :  { %v66_v32 = vsel %vm60_vm0, %v64_v27, 0.0 }
  0x2f   :  { %68 = vst [vmem:[#allocation7] sm:$0xff] %v66_v32  ;;  %vm61_vm1 = vcmp.ge.u32.totalorder %v59_v31, 2147483648 }
  0x30   :  { %v67_v33 = vsel %vm61_vm1, %v65_v30, 0.0 }
  0x31   :  { %69 = vst [vmem:[#allocation7 + $0x8] sm:$0xff] %v67_v33 }
  0x32   :  { %124 = shalt.err (!%p121_p12)
}
  0x33   :  { %s125_s29 = scalar_lea.hbm %s193_s2, 256 }
  0x34   :  { %p126_p13 = scmp.ne.s32.totalorder %s193_s2, %s125_s29  ;;  %p129_p0 = scmp.lt.u32.totalorder %s125_s29, %s193_s2 }
  0x36   :  { %p131_p1 = pnand %p129_p0, %p126_p13 }
  0x38   :  { %134 = shalt.err (!%p131_p1)
}
  0x39   :  { %81 = dma.vmem_to_hbm [thread:$0]  %s76_s1, 256, %s193_s2, [#allocation6], %s140_s19, %s140_s19, %s141_s20  }
  0x3a   :  { %137 = dma.done.wait [#allocation6], 256  }
  0x3b   :  { %138 = vsyncadd [#allocation6], 4294967040 }
  0x3c   :  { %85 = vsyncpa [#allocation5], 1 }
  0x3d   :  { %86 = vsyncpa [#allocation6], 1 }

</bundles_post_ra>
